<compile_context>
chip_gen: v7x
topology: tpu7x:2x2x1
jax: 0.10.0
libtpu: 0.0.40
codegen_flags: <defaults>
</compile_context>

<pallas_src>
import functools

import jax
import jax.numpy as jnp
from jax.experimental import pallas as pl
from jax.experimental.pallas import tpu as pltpu


def _round_up(a, b):
    return (a + b - 1) // b * b


def _cdiv(a, b):
    return (a + b - 1) // b


def _block_diag(blocks):
    """Dense block-diagonal from a list of small 2-D arrays (trace-time)."""
    rows = sum(b.shape[0] for b in blocks)
    cols = sum(b.shape[1] for b in blocks)
    out = jnp.zeros((rows, cols), blocks[0].dtype)
    r = c = 0
    for b in blocks:
        out = out.at[r:r + b.shape[0], c:c + b.shape[1]].set(b)
        r += b.shape[0]
        c += b.shape[1]
    return out


# ----------------------------------------------------------------------------- 
# Packed kernel: R = 128 // dim_in consecutive batch rows per sublane row.
# All cross-lane reshuffles are precomputed one-hot matrices driven on the MXU;
# elementwise work is full-width; output store is lane-dense (R*d = 128 lanes).
# -----------------------------------------------------------------------------
def _vertex_conv_kernel_packed(x_ref, wbig_ref, bkk_ref, gsum_ref, aw_ref,
                               eexp_ref, csum_ref, bk1_ref, o_ref):
    xf = x_ref[...].astype(jnp.float32)                       # (tn_p, R*k*d)

    # Grouped Conv1d(k, k*k, d, groups=k) for all R packed rows: one MXU matmul
    # against the block-diagonal (R*k*d, R*k*k) weight.
    s = jnp.dot(xf, wbig_ref[...],
                preferred_element_type=jnp.float32) + bkk_ref[...]  # (tn_p, R*k*k)

    # Softmax over j inside each (replica r, group i) segment of k lanes.
    # Subtracting the per-row max (>= every segment max) is an exact softmax
    # invariant and costs a single XLU lane reduce.
    m = jnp.max(s, axis=-1, keepdims=True)
    e = jnp.exp(s - m)
    # Segment sums broadcast back to each segment's lanes (one-hot G matmul).
    denom = jnp.dot(e, gsum_ref[...], preferred_element_type=jnp.float32)
    scaled = e * pl.reciprocal(denom, approx=True)             # EUP vrcp slot

    # alpha[n, (r,j)] = sum_i wk1[i] * softmax(...)[n, (r,i,j)]  (wk1 folded in).
    alpha = jnp.dot(scaled, aw_ref[...], preferred_element_type=jnp.float32)

    # out[n, (r,dd)] = sum_j alpha[n,(r,j)] * x[n,(r,j,dd)] + bk1, lane-dense.
    aexp = jnp.dot(alpha, eexp_ref[...], preferred_element_type=jnp.float32)
    prod = aexp * xf
    out = jnp.dot(prod, csum_ref[...],
                  preferred_element_type=jnp.float32) + bk1_ref[0]
    o_ref[...] = out.astype(o_ref.dtype)


# ----------------------------------------------------------------------------- 
# General fallback kernel (any k, dim_in). Correct but lane-sparse.
# -----------------------------------------------------------------------------
def _vertex_conv_kernel_general(x_ref, wblk_ref, bkk_ref, wk1_ref, bk1_ref,
                                o_ref, *, k, d):
    xf = x_ref[...].astype(jnp.float32)                        # (tn, k*d)
    s = jnp.dot(xf, wblk_ref[...],
                preferred_element_type=jnp.float32) + bkk_ref[...]   # (tn, k*k)

    alpha = None
    for i in range(k):                                         # k is tiny/static
        si = s[:, i * k:(i + 1) * k]
        ei = jnp.exp(si - jnp.max(si, axis=-1, keepdims=True))
        scale = wk1_ref[i] * pl.reciprocal(
            jnp.sum(ei, axis=-1, keepdims=True), approx=True)
        contrib = ei * scale
        alpha = contrib if alpha is None else alpha + contrib  # (tn, k)

    out = None
    for j in range(k):
        term = alpha[:, j:j + 1] * xf[:, j * d:(j + 1) * d]    # (tn, d)
        out = term if out is None else out + term
    out = out + bk1_ref[0]
    o_ref[...] = out.astype(o_ref.dtype)


# ----------------------------------------------------------------------------- 
# Constant builders (trace-time; tiny).
# -----------------------------------------------------------------------------
def _build_packed_constants(wkk, bkk, wk1, bk1, k, d, R):
    kd, kk = k * d, k * k
    wkk_r = jnp.reshape(wkk, (k, k, d)).astype(jnp.float32)
    # Per-group block diagonal (k*d, k*k): Wg[i*d+dd, i*k+j] = wkk[i*k+j, 0, dd].
    wg = _block_diag([jnp.transpose(wkk_r[i]) for i in range(k)])
    wbig = _block_diag([wg] * R)                                    # (R*kd, R*kk)
    bkkb = jnp.tile(jnp.reshape(bkk, (1, kk)).astype(jnp.float32), (1, R))

    # Segment-sum matrix: lanes a, b in the same (r, i) group of k lanes.
    a = jnp.arange(R * kk)
    gsum = (a[:, None] // k == a[None, :] // k).astype(jnp.float32)

    # Weighted i-sum: A[(r,i,j), (r,j)] = wk1[i].
    r_a, i_a, j_a = a // kk, (a % kk) // k, a % k
    wk1f = jnp.reshape(wk1, (k,)).astype(jnp.float32)
    aw = jnp.zeros((R * kk, R * k), jnp.float32).at[
        a, r_a * k + j_a].set(wk1f[i_a])

    # Lane expansion: E[(r,j), (r, j*d + dd)] = 1.
    p = jnp.arange(R * k)
    cols = ((p // k) * kd + (p % k) * d)[:, None] + jnp.arange(d)[None, :]
    eexp = jnp.zeros((R * k, R * kd), jnp.float32).at[p[:, None], cols].set(1.0)

    # j-sum + compaction: C[(r, j*d + dd), (r*d + dd)] = 1.
    q = jnp.arange(R * kd)
    csum = jnp.zeros((R * kd, R * d), jnp.float32).at[
        q, (q // kd) * d + (q % d)].set(1.0)

    bk1v = jnp.reshape(bk1, (1,)).astype(jnp.float32)
    return wbig, bkkb, gsum, aw, eexp, csum, bk1v


def _build_general_constants(wkk, bkk, wk1, bk1, k, d):
    kk = k * k
    wkk_r = jnp.reshape(wkk, (k, k, d)).astype(jnp.float32)
    wblk = _block_diag([jnp.transpose(wkk_r[i]) for i in range(k)])  # (k*d, k*k)
    bkkr = jnp.reshape(bkk, (1, kk)).astype(jnp.float32)
    wk1r = jnp.reshape(wk1, (k,)).astype(jnp.float32)
    bk1v = jnp.reshape(bk1, (1,)).astype(jnp.float32)
    return wblk, bkkr, wk1r, bk1v


# ----------------------------------------------------------------------------- 
# Wrapper
# -----------------------------------------------------------------------------
def vertex_conv(region_feats, wkk, bkk, wk1, bk1, *, tn=8192):
    """region_feats: (N, k, dim_in). wkk: (k*k, 1, dim_in), bkk: (k*k,),
    wk1: (1, k, 1), bk1: (1,). Returns (N, dim_in)."""
    N, k, d = region_feats.shape
    kd, kk = k * d, k * k
    out_dtype = region_feats.dtype

    packed = (128 % d == 0)           # lane-dense path needs R*d == 128 exactly
    R = 128 // d if packed else 1
    gran = 8 * R                      # original rows per sublane granule

    # --- tile / grid selection (tn counts ORIGINAL batch rows) ----------------
    grid_n = max(1, _cdiv(N, tn))
    if grid_n == 1 and N > 4096:
        grid_n = 2                    # >=2 steps so both v7x TensorCores work
    tn_eff = _round_up(_cdiv(N, grid_n), gran)
    n_pad = tn_eff * grid_n

    x2 = region_feats.reshape(N, kd)  # free contiguous reshape
    if n_pad != N:
        x2 = jnp.pad(x2, ((0, n_pad - N), (0, 0)))

    compiler_params = pltpu.CompilerParams(
        dimension_semantics=("parallel",),
        vmem_limit_bytes=48 * 1024 * 1024)

    if packed:
        wbig, bkkb, gsum, aw, eexp, csum, bk1v = _build_packed_constants(
            wkk, bkk, wk1, bk1, k, d, R)
        xp = x2.reshape(n_pad // R, R * kd)       # free reshape, lane-dense
        tn_p = tn_eff // R
        out = pl.pallas_call(
            _vertex_conv_kernel_packed,
            out_shape=jax.ShapeDtypeStruct((n_pad // R, R * d), out_dtype),
            grid_spec=pltpu.PrefetchScalarGridSpec(
                num_scalar_prefetch=0,
                grid=(grid_n,),
                in_specs=[
                    pl.BlockSpec((tn_p, R * kd), lambda n: (n, 0)),      # x tile
                    pl.BlockSpec((R * kd, R * kk), lambda n: (0, 0)),    # Wbig
                    pl.BlockSpec((1, R * kk), lambda n: (0, 0)),         # bkk row
                    pl.BlockSpec((R * kk, R * kk), lambda n: (0, 0)),    # G (seg-sum)
                    pl.BlockSpec((R * kk, R * k), lambda n: (0, 0)),     # A_w
                    pl.BlockSpec((R * k, R * kd), lambda n: (0, 0)),     # E (expand)
                    pl.BlockSpec((R * kd, R * d), lambda n: (0, 0)),     # C (j-sum)
                    pl.BlockSpec(memory_space=pltpu.MemorySpace.SMEM),   # bk1
                ],
                out_specs=pl.BlockSpec((tn_p, R * d), lambda n: (n, 0)),
            ),
            compiler_params=compiler_params,
        )(xp, wbig, bkkb, gsum, aw, eexp, csum, bk1v)
        out = out.reshape(n_pad, d)               # free unpack reshape
    else:
        # TODO(synk): lane-sparse fallback when 128 % dim_in != 0 — correct, but
        # output stores are masked (< 128 lanes) and intermediates lane-sparse.
        wblk, bkkr, wk1r, bk1v = _build_general_constants(wkk, bkk, wk1, bk1, k, d)
        kernel = functools.partial(_vertex_conv_kernel_general, k=k, d=d)
        out = pl.pallas_call(
            kernel,
            out_shape=jax.ShapeDtypeStruct((n_pad, d), out_dtype),
            grid_spec=pltpu.PrefetchScalarGridSpec(
                num_scalar_prefetch=0,
                grid=(grid_n,),
                in_specs=[
                    pl.BlockSpec((tn_eff, kd), lambda n: (n, 0)),        # x tile
                    pl.BlockSpec((kd, kk), lambda n: (0, 0)),            # Wblk
                    pl.BlockSpec((1, kk), lambda n: (0, 0)),             # bkk row
                    pl.BlockSpec(memory_space=pltpu.MemorySpace.SMEM),   # wk1
                    pl.BlockSpec(memory_space=pltpu.MemorySpace.SMEM),   # bk1
                ],
                out_specs=pl.BlockSpec((tn_eff, d), lambda n: (n, 0)),
            ),
            compiler_params=compiler_params,
        )(x2, wblk, bkkr, wk1r, bk1v)

    return out[:N] if n_pad != N else out


# ----------------------------------------------------------------------------- 
# Pure-JAX reference (HIGHEST precision)
# -----------------------------------------------------------------------------
def vertex_conv_reference(region_feats, wkk, bkk, wk1, bk1):
    N, k, d = region_feats.shape
    x = region_feats.astype(jnp.float32)
    wkk_r = jnp.reshape(wkk, (k, k, d)).astype(jnp.float32)
    bkk_r = jnp.reshape(bkk, (k, k)).astype(jnp.float32)
    scores = jnp.einsum("nid,ijd->nij", x, wkk_r, precision="highest") + bkk_r[None]
    mult = jax.nn.softmax(scores, axis=-1)
    tf = jnp.einsum("nij,njd->nid", mult, x, precision="highest")
    out = jnp.einsum("nid,i->nd", tf, jnp.reshape(wk1, (k,)).astype(jnp.float32),
                     precision="highest") + jnp.reshape(bk1, ()).astype(jnp.float32)
    return out.astype(region_feats.dtype)


def _check(out, ref, name):
    # DEFAULT-precision MXU passes + approx reciprocal => relaxed tolerance
    # (deliberate; see header).
    err = float(jnp.max(jnp.abs(out - ref)))
    assert jnp.allclose(out, ref, atol=2e-2, rtol=2e-2), (name, err)


if __name__ == "__main__":
    N, k, dim_in = 16, 4, 32

    key = jax.random.PRNGKey(0)
    kx, kw1, kb1, kw2, kb2 = jax.random.split(key, 5)

    region_feats = jax.random.normal(kx, (N, k, dim_in), dtype=jnp.float32)
    # convKK: Conv1d(k, k*k, kernel_size=dim_in, groups=k)
    wkk = 0.1 * jax.random.normal(kw1, (k * k, 1, dim_in), dtype=jnp.float32)
    bkk = 0.1 * jax.random.normal(kb1, (k * k,), dtype=jnp.float32)
    # convK1: Conv1d(k, 1, kernel_size=1)
    wk1 = 0.1 * jax.random.normal(kw2, (1, k, 1), dtype=jnp.float32)
    bk1 = 0.1 * jax.random.normal(kb2, (1,), dtype=jnp.float32)

    # 1) Packed lane-dense path, single grid step.
    fn = jax.jit(functools.partial(vertex_conv, tn=8192))
    out = jax.block_until_ready(fn(region_feats, wkk, bkk, wk1, bk1))
    ref = vertex_conv_reference(region_feats, wkk, bkk, wk1, bk1)
    assert out.shape == (N, dim_in), out.shape
    _check(out, ref, "packed-small")

    # 2) Packed path, N not divisible by the tile -> padding + multi-step grid.
    N2 = 200
    rf2 = jax.random.normal(jax.random.fold_in(kx, 1), (N2, k, dim_in),
                            dtype=jnp.float32)
    fn2 = jax.jit(functools.partial(vertex_conv, tn=64))
    out2 = jax.block_until_ready(fn2(rf2, wkk, bkk, wk1, bk1))
    assert out2.shape == (N2, dim_in), out2.shape
    _check(out2, vertex_conv_reference(rf2, wkk, bkk, wk1, bk1), "packed-pad")

    # 3) Mid-sized N with the default tile -> exercises the 2-step v7x split.
    N3 = 6000
    rf3 = jax.random.normal(jax.random.fold_in(kx, 2), (N3, k, dim_in),
                            dtype=jnp.float32)
    out3 = jax.block_until_ready(fn(rf3, wkk, bkk, wk1, bk1))
    assert out3.shape == (N3, dim_in), out3.shape
    _check(out3, vertex_conv_reference(rf3, wkk, bkk, wk1, bk1), "packed-split")

    # 4) General fallback path (128 % dim_in != 0).
    k4, d4, N4 = 3, 20, 40
    kx4 = jax.random.fold_in(key, 3)
    rf4 = jax.random.normal(kx4, (N4, k4, d4), dtype=jnp.float32)
    wkk4 = 0.1 * jax.random.normal(jax.random.fold_in(kx4, 1),
                                   (k4 * k4, 1, d4), dtype=jnp.float32)
    bkk4 = 0.1 * jax.random.normal(jax.random.fold_in(kx4, 2),
                                   (k4 * k4,), dtype=jnp.float32)
    wk14 = 0.1 * jax.random.normal(jax.random.fold_in(kx4, 3),
                                   (1, k4, 1), dtype=jnp.float32)
    bk14 = 0.1 * jax.random.normal(jax.random.fold_in(kx4, 4),
                                   (1,), dtype=jnp.float32)
    fn4 = jax.jit(functools.partial(vertex_conv, tn=16))
    out4 = jax.block_until_ready(fn4(rf4, wkk4, bkk4, wk14, bk14))
    assert out4.shape == (N4, d4), out4.shape
    _check(out4, vertex_conv_reference(rf4, wkk4, bkk4, wk14, bk14), "fallback")

    print("KERNEL_OK")
</pallas_src>

<mosaic_0001>
module attributes {stable_mosaic.version = 11 : i64} {
  func.func @_vertex_conv_kernel_packed(%arg0: i32, %arg1: memref<8x512xf32, #tpu.memory_space<vmem>>, %arg2: memref<512x64xf32, #tpu.memory_space<vmem>>, %arg3: memref<1x64xf32, #tpu.memory_space<vmem>>, %arg4: memref<64x64xf32, #tpu.memory_space<vmem>>, %arg5: memref<64x16xf32, #tpu.memory_space<vmem>>, %arg6: memref<16x512xf32, #tpu.memory_space<vmem>>, %arg7: memref<512x128xf32, #tpu.memory_space<vmem>>, %arg8: memref<1xf32, #tpu.memory_space<smem>>, %arg9: memref<8x128xf32, #tpu.memory_space<vmem>>) attributes {dimension_semantics = [#tpu.dimension_semantics<parallel>], iteration_bounds = array<i64: 1>, scalar_prefetch = 0 : i64, scratch_operands = 0 : i64, tpu.core_type = #tpu.core_type<tc>, window_params = [{transform_indices = @transform_0, window_bounds = array<i64: 8, 512>}, {pipeline_mode = #tpu.pipeline_mode<synchronous>, transform_indices = @transform_1, window_bounds = array<i64: 512, 64>}, {pipeline_mode = #tpu.pipeline_mode<synchronous>, transform_indices = @transform_2, window_bounds = array<i64: 1, 64>}, {pipeline_mode = #tpu.pipeline_mode<synchronous>, transform_indices = @transform_3, window_bounds = array<i64: 64, 64>}, {pipeline_mode = #tpu.pipeline_mode<synchronous>, transform_indices = @transform_4, window_bounds = array<i64: 64, 16>}, {pipeline_mode = #tpu.pipeline_mode<synchronous>, transform_indices = @transform_5, window_bounds = array<i64: 16, 512>}, {pipeline_mode = #tpu.pipeline_mode<synchronous>, transform_indices = @transform_6, window_bounds = array<i64: 512, 128>}, {transform_indices = @transform_7, window_bounds = array<i64: 1>}, {transform_indices = @transform_8, window_bounds = array<i64: 8, 128>}]} {
    %c0 = arith.constant 0 : index
    %c0_0 = arith.constant 0 : index
    %0 = vector.load %arg1[%c0, %c0_0] : memref<8x512xf32, #tpu.memory_space<vmem>>, vector<8x512xf32>
    %c0_1 = arith.constant 0 : index
    %c0_2 = arith.constant 0 : index
    %1 = vector.load %arg2[%c0_1, %c0_2] : memref<512x64xf32, #tpu.memory_space<vmem>>, vector<512x64xf32>
    %cst = arith.constant dense<0.000000e+00> : vector<8x64xf32>
    %2 = tpu.matmul %0, %1, %cst {dimension_numbers = #tpu.dot_dimension_numbers<[1], [0], [0], [1], [0, 0, 1, 1], [], []>} : vector<8x512xf32>, vector<512x64xf32>, vector<8x64xf32> -> vector<8x64xf32>
    %c0_3 = arith.constant 0 : index
    %c0_4 = arith.constant 0 : index
    %3 = vector.load %arg3[%c0_3, %c0_4] : memref<1x64xf32, #tpu.memory_space<vmem>>, vector<1x64xf32>
    %4 = vector.broadcast %3 : vector<1x64xf32> to vector<8x64xf32>
    %5 = arith.addf %2, %4 : vector<8x64xf32>
    %cst_5 = arith.constant dense<0xFF800000> : vector<8xf32>
    %6 = vector.multi_reduction <maximumf>, %5, %cst_5 [1] : vector<8x64xf32> to vector<8xf32>
    %7 = vector.shape_cast %6 : vector<8xf32> to vector<8x1xf32>
    %8 = vector.broadcast %7 : vector<8x1xf32> to vector<8x64xf32>
    %9 = arith.subf %5, %8 : vector<8x64xf32>
    %10 = math.exp %9 : vector<8x64xf32>
    %c0_6 = arith.constant 0 : index
    %c0_7 = arith.constant 0 : index
    %11 = vector.load %arg4[%c0_6, %c0_7] : memref<64x64xf32, #tpu.memory_space<vmem>>, vector<64x64xf32>
    %cst_8 = arith.constant dense<0.000000e+00> : vector<8x64xf32>
    %12 = tpu.matmul %10, %11, %cst_8 {dimension_numbers = #tpu.dot_dimension_numbers<[1], [0], [0], [1], [0, 0, 1, 1], [], []>} : vector<8x64xf32>, vector<64x64xf32>, vector<8x64xf32> -> vector<8x64xf32>
    %13 = tpu.reciprocal %12 {approx = true} : vector<8x64xf32> -> vector<8x64xf32>
    %14 = arith.mulf %10, %13 : vector<8x64xf32>
    %c0_9 = arith.constant 0 : index
    %c0_10 = arith.constant 0 : index
    %15 = vector.load %arg5[%c0_9, %c0_10] : memref<64x16xf32, #tpu.memory_space<vmem>>, vector<64x16xf32>
    %cst_11 = arith.constant dense<0.000000e+00> : vector<8x16xf32>
    %16 = tpu.matmul %14, %15, %cst_11 {dimension_numbers = #tpu.dot_dimension_numbers<[1], [0], [0], [1], [0, 0, 1, 1], [], []>} : vector<8x64xf32>, vector<64x16xf32>, vector<8x16xf32> -> vector<8x16xf32>
    %c0_12 = arith.constant 0 : index
    %c0_13 = arith.constant 0 : index
    %17 = vector.load %arg6[%c0_12, %c0_13] : memref<16x512xf32, #tpu.memory_space<vmem>>, vector<16x512xf32>
    %cst_14 = arith.constant dense<0.000000e+00> : vector<8x512xf32>
    %18 = tpu.matmul %16, %17, %cst_14 {dimension_numbers = #tpu.dot_dimension_numbers<[1], [0], [0], [1], [0, 0, 1, 1], [], []>} : vector<8x16xf32>, vector<16x512xf32>, vector<8x512xf32> -> vector<8x512xf32>
    %19 = arith.mulf %18, %0 : vector<8x512xf32>
    %c0_15 = arith.constant 0 : index
    %c0_16 = arith.constant 0 : index
    %20 = vector.load %arg7[%c0_15, %c0_16] : memref<512x128xf32, #tpu.memory_space<vmem>>, vector<512x128xf32>
    %cst_17 = arith.constant dense<0.000000e+00> : vector<8x128xf32>
    %21 = tpu.matmul %19, %20, %cst_17 {dimension_numbers = #tpu.dot_dimension_numbers<[1], [0], [0], [1], [0, 0, 1, 1], [], []>} : vector<8x512xf32>, vector<512x128xf32>, vector<8x128xf32> -> vector<8x128xf32>
    %c0_18 = arith.constant 0 : index
    %22 = memref.load %arg8[%c0_18] : memref<1xf32, #tpu.memory_space<smem>>
    %23 = vector.broadcast %22 : f32 to vector<8x128xf32>
    %24 = arith.addf %21, %23 : vector<8x128xf32>
    %c0_19 = arith.constant 0 : index
    %c0_20 = arith.constant 0 : index
    %25 = vector.load %arg9[%c0_19, %c0_20] : memref<8x128xf32, #tpu.memory_space<vmem>>, vector<8x128xf32>
    tpu.vector_store %arg9[%c0_19, %c0_20], %24 {strides = array<i32>} : memref<8x128xf32, #tpu.memory_space<vmem>>, vector<8x128xf32>,
    return
  }
  func.func @transform_0(%arg0: i32) -> (i32, i32) {
    %c0_i32 = arith.constant 0 : i32
    %c0_i32_0 = arith.constant 0 : i32
    return %arg0, %c0_i32 : i32, i32
  }
  func.func @transform_1(%arg0: i32) -> (i32, i32) {
    %c0_i32 = arith.constant 0 : i32
    %c0_i32_0 = arith.constant 0 : i32
    %c0_i32_1 = arith.constant 0 : i32
    return %c0_i32, %c0_i32_0 : i32, i32
  }
  func.func @transform_2(%arg0: i32) -> (i32, i32) {
    %c0_i32 = arith.constant 0 : i32
    %c0_i32_0 = arith.constant 0 : i32
    %c0_i32_1 = arith.constant 0 : i32
    return %c0_i32, %c0_i32_0 : i32, i32
  }
  func.func @transform_3(%arg0: i32) -> (i32, i32) {
    %c0_i32 = arith.constant 0 : i32
    %c0_i32_0 = arith.constant 0 : i32
    %c0_i32_1 = arith.constant 0 : i32
    return %c0_i32, %c0_i32_0 : i32, i32
  }
  func.func @transform_4(%arg0: i32) -> (i32, i32) {
    %c0_i32 = arith.constant 0 : i32
    %c0_i32_0 = arith.constant 0 : i32
    %c0_i32_1 = arith.constant 0 : i32
    return %c0_i32, %c0_i32_0 : i32, i32
  }
  func.func @transform_5(%arg0: i32) -> (i32, i32) {
    %c0_i32 = arith.constant 0 : i32
    %c0_i32_0 = arith.constant 0 : i32
    %c0_i32_1 = arith.constant 0 : i32
    return %c0_i32, %c0_i32_0 : i32, i32
  }
  func.func @transform_6(%arg0: i32) -> (i32, i32) {
    %c0_i32 = arith.constant 0 : i32
    %c0_i32_0 = arith.constant 0 : i32
    %c0_i32_1 = arith.constant 0 : i32
    return %c0_i32, %c0_i32_0 : i32, i32
  }
  func.func @transform_7(%arg0: i32) -> i32 {
    %c0_i32 = arith.constant 0 : i32
    %c0_i32_0 = arith.constant 0 : i32
    return %c0_i32 : i32
  }
  func.func @transform_8(%arg0: i32) -> (i32, i32) {
    %c0_i32 = arith.constant 0 : i32
    %c0_i32_0 = arith.constant 0 : i32
    return %arg0, %c0_i32 : i32, i32
  }
}

</mosaic_0001>

<bundles_post_ra>
// kernel: vertex_conv.1
= control target key start
LH: loop header
LB: loop body
LE: loop exit
PB: predicated region body
PF: predicated region fallthrough
CT: control target
= control target key end

     0   :  { %vm245_vm0 = vcmask 523264   ;;  %vm1154_vm1 = vmmov 0   ;;  %vm424_vm2 = vcmask 130048   ;;  %s1699_s1 = inlined_call_operand.vmem [shape: f32[512,64], index: 1, kind: input, shape index: {}]   ;;  %s1700_s0 = inlined_call_operand.vmem [shape: f32[8,512], index: 0, kind: input, shape index: {}]   ;;  %s1701_s2 = inlined_call_operand.vmem [shape: f32[1,64], index: 2, kind: input, shape index: {}]   ;;  %s1702_s3 = inlined_call_operand.vmem [shape: f32[64,64], index: 3, kind: input, shape index: {}]   ;;  %s1703_s4 = inlined_call_operand.vmem [shape: f32[64,16], index: 4, kind: input, shape index: {}]   ;;  %s1704_s5 = inlined_call_operand.vmem [shape: f32[16,512], index: 5, kind: input, shape index: {}]   ;;  %s1705_s6 = inlined_call_operand.vmem [shape: f32[512,128], index: 6, kind: input, shape index: {}]   ;;  %s1706_s7 = inlined_call_operand.<no memory space> [shape: f32[1], index: 7, kind: input, shape index: {}]   ;;  %s1707_s8 = inlined_call_operand.vmem [shape: f32[8,128], index: 8, kind: output, shape index: {}]  }
   0x1   :  { %v50_v0 = vld [vmem:[%s1699_s1 + $0x80] sm:$0xff]  ;;  %v51_v1 = vld [vmem:[%s1699_s1 + $0x88] sm:$0xff]  ;;  %v52_v11 = vld [vmem:[%s1699_s1 + $0x90] sm:$0xff] }
   0x2   :  { %v34_v2 = vld [vmem:[%s1699_s1] sm:$0xff]  ;;  %v986_v3 = vpack.c.bf16 %v51_v1, %v50_v0  ;;  %v35_v4 = vld [vmem:[%s1699_s1 + $0x8] sm:$0xff]  ;;  %v53_v13 = vld [vmem:[%s1699_s1 + $0x98] sm:$0xff] }
   0x3   :  { %v82_v5 = vld [vmem:[%s1699_s1 + $0x180] sm:$0xff]  ;;  %v83_v6 = vld [vmem:[%s1699_s1 + $0x188] sm:$0xff]  ;;  %v988_v7 = vpack.c.bf16 %v35_v4, %v34_v2  ;;  %v36_v14 = vld [vmem:[%s1699_s1 + $0x10] sm:$0xff]  ;;  %v990_v16 = vpack.c.bf16 %v53_v13, %v52_v11 }
   0x4   :  { %v1018_v8 = vpack.c.bf16 %v83_v6, %v82_v5  ;;  %v66_v9 = vld [vmem:[%s1699_s1 + $0x100] sm:$0xff]  ;;  %v67_v10 = vld [vmem:[%s1699_s1 + $0x108] sm:$0xff]  ;;  %987 = vmatprep.subr.bf16.mxu0 %v986_v3  ;;  %v37_v15 = vld [vmem:[%s1699_s1 + $0x18] sm:$0xff] }
   0x5   :  { %v1020_v12 = vpack.c.bf16 %v67_v10, %v66_v9  ;;  %989 = vmatpush3.bf16.msra.mxu0 %v988_v7  ;;  %v992_v17 = vpack.c.bf16 %v37_v15, %v36_v14  ;;  %v84_v18 = vld [vmem:[%s1699_s1 + $0x190] sm:$0xff]  ;;  %v85_v19 = vld [vmem:[%s1699_s1 + $0x198] sm:$0xff]  ;;  %v54_v23 = vld [vmem:[%s1699_s1 + $0xa0] sm:$0xff] }
   0x6   :  { %1019 = vmatprep.subr.bf16.mxu1 %v1018_v8  ;;  %v68_v20 = vld [vmem:[%s1699_s1 + $0x110] sm:$0xff]  ;;  %v1022_v21 = vpack.c.bf16 %v85_v19, %v84_v18  ;;  %v69_v22 = vld [vmem:[%s1699_s1 + $0x118] sm:$0xff]  ;;  %v55_v24 = vld [vmem:[%s1699_s1 + $0xa8] sm:$0xff]  ;;  %991 = vmatprep.subr.bf16.mxu0 %v990_v16 }
   0x7   :  { %1021 = vmatpush3.bf16.msra.mxu1 %v1020_v12  ;;  %v1024_v25 = vpack.c.bf16 %v69_v22, %v68_v20  ;;  %v994_v26 = vpack.c.bf16 %v55_v24, %v54_v23  ;;  %v38_v27 = vld [vmem:[%s1699_s1 + $0x20] sm:$0xff]  ;;  %v39_v28 = vld [vmem:[%s1699_s1 + $0x28] sm:$0xff]  ;;  %v56_v35 = vld [vmem:[%s1699_s1 + $0xb0] sm:$0xff] }
   0x8   :  { %v86_v29 = vld [vmem:[%s1699_s1 + $0x1a0] sm:$0xff]  ;;  %1023 = vmatprep.subr.bf16.mxu1 %v1022_v21  ;;  %v87_v30 = vld [vmem:[%s1699_s1 + $0x1a8] sm:$0xff]  ;;  %v996_v33 = vpack.c.bf16 %v39_v28, %v38_v27  ;;  %v57_v36 = vld [vmem:[%s1699_s1 + $0xb8] sm:$0xff] }
   0x9   :  { %v70_v31 = vld [vmem:[%s1699_s1 + $0x120] sm:$0xff]  ;;  %v71_v32 = vld [vmem:[%s1699_s1 + $0x128] sm:$0xff]  ;;  %993 = vmatpush3.bf16.msra.mxu0 %v992_v17  ;;  %v1026_v34 = vpack.c.bf16 %v87_v30, %v86_v29  ;;  %v40_v37 = vld [vmem:[%s1699_s1 + $0x30] sm:$0xff]  ;;  %v998_v39 = vpack.c.bf16 %v57_v36, %v56_v35 }
   0xa   :  { %995 = vmatprep.subr.bf16.mxu0 %v994_v26  ;;  %v1028_v38 = vpack.c.bf16 %v71_v32, %v70_v31  ;;  %v41_v40 = vld [vmem:[%s1699_s1 + $0x38] sm:$0xff]  ;;  %v88_v41 = vld [vmem:[%s1699_s1 + $0x1b0] sm:$0xff]  ;;  %v58_v46 = vld [vmem:[%s1699_s1 + $0xc0] sm:$0xff] }
   0xb   :  { %1025 = vmatpush3.bf16.msra.mxu1 %v1024_v25  ;;  %v89_v42 = vld [vmem:[%s1699_s1 + $0x1b8] sm:$0xff]  ;;  %v72_v44 = vld [vmem:[%s1699_s1 + $0x130] sm:$0xff]  ;;  %v59_v47 = vld [vmem:[%s1699_s1 + $0xc8] sm:$0xff]  ;;  %v1000_v48 = vpack.c.bf16 %v41_v40, %v40_v37 }
   0xc   :  { %1027 = vmatprep.subr.bf16.mxu1 %v1026_v34  ;;  %v1030_v43 = vpack.c.bf16 %v89_v42, %v88_v41  ;;  %v73_v45 = vld [vmem:[%s1699_s1 + $0x138] sm:$0xff]  ;;  %v90_v49 = vld [vmem:[%s1699_s1 + $0x1c0] sm:$0xff]  ;;  %v91_v50 = vld [vmem:[%s1699_s1 + $0x1c8] sm:$0xff]  ;;  %v1002_v52 = vpack.c.bf16 %v59_v47, %v58_v46 }
   0xd   :  { %997 = vmatpush3.bf16.msra.mxu0 %v996_v33  ;;  %v1032_v51 = vpack.c.bf16 %v73_v45, %v72_v44  ;;  %v42_v53 = vld [vmem:[%s1699_s1 + $0x40] sm:$0xff]  ;;  %v43_v54 = vld [vmem:[%s1699_s1 + $0x48] sm:$0xff]  ;;  %v1034_v56 = vpack.c.bf16 %v91_v50, %v90_v49  ;;  %v60_v58 = vld [vmem:[%s1699_s1 + $0xd0] sm:$0xff]  ;;  %v1153_v49 = vmov 0.0|0.0  }
   0xe   :  { %999 = vmatprep.subr.bf16.mxu0 %v998_v39  ;;  %v74_v55 = vld [vmem:[%s1699_s1 + $0x140] sm:$0xff]  ;;  %v75_v57 = vld [vmem:[%s1699_s1 + $0x148] sm:$0xff]  ;;  %v61_v59 = vld [vmem:[%s1699_s1 + $0xd8] sm:$0xff]  ;;  %v1004_v62 = vpack.c.bf16 %v43_v54, %v42_v53 }
   0xf   :  { %1029 = vmatpush3.bf16.msra.mxu1 %v1028_v38  ;;  %v92_v60 = vld [vmem:[%s1699_s1 + $0x1d0] sm:$0xff]  ;;  %v93_v61 = vld [vmem:[%s1699_s1 + $0x1d8] sm:$0xff]  ;;  %v1036_v63 = vpack.c.bf16 %v75_v57, %v74_v55  ;;  %v1006_v0 = vpack.c.bf16 %v61_v59, %v60_v58  ;;  %v62_v6 = vld [vmem:[%s1699_s1 + $0xe0] sm:$0xff]  ;;  %v1155_v58 = vmov 0.0  }
  0x10   :  { %1031 = vmatprep.subr.bf16.mxu1 %v1030_v43  ;;  %v44_v1 = vld [vmem:[%s1699_s1 + $0x50] sm:$0xff]  ;;  %v45_v2 = vld [vmem:[%s1699_s1 + $0x58] sm:$0xff]  ;;  %v1038_v4 = vpack.c.bf16 %v93_v61, %v92_v60  ;;  %v63_v7 = vld [vmem:[%s1699_s1 + $0xe8] sm:$0xff] }
  0x11   :  { %1001 = vmatpush3.bf16.msra.mxu0 %v1000_v48  ;;  %v76_v3 = vld [vmem:[%s1699_s1 + $0x150] sm:$0xff]  ;;  %v77_v5 = vld [vmem:[%s1699_s1 + $0x158] sm:$0xff]  ;;  %v94_v8 = vld [vmem:[%s1699_s1 + $0x1e0] sm:$0xff]  ;;  %v1008_v10 = vpack.c.bf16 %v45_v2, %v44_v1  ;;  %v1010_v14 = vpack.c.bf16 %v63_v7, %v62_v6 }
  0x12   :  { %1003 = vmatprep.subr.bf16.mxu0 %v1002_v52  ;;  %v95_v9 = vld [vmem:[%s1699_s1 + $0x1e8] sm:$0xff]  ;;  %v46_v11 = vld [vmem:[%s1699_s1 + $0x60] sm:$0xff]  ;;  %v1040_v13 = vpack.c.bf16 %v77_v5, %v76_v3  ;;  %v64_v19 = vld [vmem:[%s1699_s1 + $0xf0] sm:$0xff] }
  0x13   :  { %1033 = vmatpush3.bf16.msra.mxu1 %v1032_v51  ;;  %v47_v12 = vld [vmem:[%s1699_s1 + $0x68] sm:$0xff]  ;;  %v78_v15 = vld [vmem:[%s1699_s1 + $0x160] sm:$0xff]  ;;  %v1042_v18 = vpack.c.bf16 %v95_v9, %v94_v8  ;;  %v65_v20 = vld [vmem:[%s1699_s1 + $0xf8] sm:$0xff] }
  0x14   :  { %1035 = vmatprep.subr.bf16.mxu1 %v1034_v56  ;;  %v79_v16 = vld [vmem:[%s1699_s1 + $0x168] sm:$0xff]  ;;  %v1384_v21 = vld [vmem:[%s1700_s0 + $0x18] sm:$0xff]  ;;  %v96_v22 = vld [vmem:[%s1699_s1 + $0x1f0] sm:$0xff]  ;;  %v1012_v24 = vpack.c.bf16 %v47_v12, %v46_v11  ;;  %v1014_v26 = vpack.c.bf16 %v65_v20, %v64_v19 }
  0x15   :  { %1005 = vmatpush3.bf16.msra.mxu0 %v1004_v62  ;;  %v1372_v17 = vld [vmem:[%s1700_s0 + $0x8] sm:$0xff]  ;;  %v97_v23 = vld [vmem:[%s1699_s1 + $0x1f8] sm:$0xff]  ;;  %239 = vmatprep.mubr.f32.mxu1 %v1384_v21  ;;  %v1044_v25 = vpack.c.bf16 %v79_v16, %v78_v15  ;;  %v48_v27 = vld [vmem:[%s1699_s1 + $0x70] sm:$0xff] }
  0x16   :  { %1007 = vmatprep.subr.bf16.mxu0 %v1006_v0  ;;  %169 = vmatprep.mubr.f32.mxu0 %v1372_v17  ;;  %v49_v28 = vld [vmem:[%s1699_s1 + $0x78] sm:$0xff]  ;;  %v1046_v29 = vpack.c.bf16 %v97_v23, %v96_v22  ;;  %v80_v30 = vld [vmem:[%s1699_s1 + $0x170] sm:$0xff]  ;;  %v1408_v34 = vld [vmem:[%s1700_s0] sm:$0xff] }
  0x17   :  { %1037 = vmatpush3.bf16.msra.mxu1 %v1036_v63  ;;  %v81_v31 = vld [vmem:[%s1699_s1 + $0x178] sm:$0xff]  ;;  %v1016_v32 = vpack.c.bf16 %v49_v28, %v48_v27  ;;  %v1413_v35 = vld [vmem:[%s1700_s0 + $0x10] sm:$0xff]  ;;  %v785_v37 = vld [vmem:[%s1701_s2] ss:$0 sm:$0xff] }
  0x18   :  { %1039 = vmatprep.subr.bf16.mxu1 %v1038_v4  ;;  %v1048_v33 = vpack.c.bf16 %v81_v31, %v80_v30  ;;  %v252_v46 = vld [vmem:[%s1702_s3] sm:$0xff]  ;;  %v253_v47 = vld [vmem:[%s1702_s3 + $0x8] sm:$0xff]  ;;  %v254_v50 = vld [vmem:[%s1702_s3 + $0x10] sm:$0xff] }
  0x19   :  { %1009 = vmatpush3.bf16.msra.mxu0 %v1008_v10  ;;  %v1051_v48 = vpack.c.bf16 %v253_v47, %v252_v46  ;;  %v255_v51 = vld [vmem:[%s1702_s3 + $0x18] sm:$0xff]  ;;  %v256_v53 = vld [vmem:[%s1702_s3 + $0x20] sm:$0xff]  ;;  %v257_v54 = vld [vmem:[%s1702_s3 + $0x28] sm:$0xff] }
  0x1a   :  { %1011 = vmatprep.subr.bf16.mxu0 %v1010_v14  ;;  %v1054_v52 = vpack.c.bf16 %v255_v51, %v254_v50  ;;  %v1057_v55 = vpack.c.bf16 %v257_v54, %v256_v53  ;;  %v258_v56 = vld [vmem:[%s1702_s3 + $0x30] sm:$0xff]  ;;  %v259_v57 = vld [vmem:[%s1702_s3 + $0x38] sm:$0xff]  ;;  %v335_v60 = vld [vmem:[%s1703_s4] sm:$0xff] }
  0x1b   :  { %1041 = vmatpush3.bf16.msra.mxu1 %v1040_v13  ;;  %v1060_v59 = vpack.c.bf16 %v259_v57, %v258_v56  ;;  %v336_v61 = vld [vmem:[%s1703_s4 + $0x8] sm:$0xff]  ;;  %v337_v3 = vld [vmem:[%s1703_s4 + $0x10] sm:$0xff]  ;;  %v338_v4 = vld [vmem:[%s1703_s4 + $0x18] sm:$0xff] }
  0x1c   :  { %1043 = vmatprep.subr.bf16.mxu1 %v1042_v18  ;;  %v1063_v62 = vpack.c.bf16 %v336_v61, %v335_v60  ;;  %v1066_v5 = vpack.c.bf16 %v338_v4, %v337_v3  ;;  %v339_v6 = vld [vmem:[%s1703_s4 + $0x20] sm:$0xff]  ;;  %v340_v7 = vld [vmem:[%s1703_s4 + $0x28] sm:$0xff]  ;;  %v341_v9 = vld [vmem:[%s1703_s4 + $0x30] sm:$0xff] }
  0x1d   :  { %1013 = vmatpush3.bf16.msra.mxu0 %v1012_v24  ;;  %v1069_v8 = vpack.c.bf16 %v340_v7, %v339_v6  ;;  %v342_v10 = vld [vmem:[%s1703_s4 + $0x38] sm:$0xff]  ;;  %v417_v12 = vld [vmem:[%s1704_s5 + $0x8] sm:$0xff]  ;;  %v416_v14 = vld [vmem:[%s1704_s5] sm:$0xff] }
  0x1e   :  { %1015 = vmatprep.subr.bf16.mxu0 %v1014_v26  ;;  %v1072_v11 = vpack.c.bf16 %v342_v10, %v341_v9  ;;  %v421_v13 = vld [vmem:[%s1704_s5 + $0x28] sm:$0xff]  ;;  %v420_v16 = vld [vmem:[%s1704_s5 + $0x20] sm:$0xff]  ;;  %v419_v18 = vld [vmem:[%s1704_s5 + $0x18] sm:$0xff] }
  0x1f   :  { %1045 = vmatpush3.bf16.msra.mxu1 %v1044_v25  ;;  %v1074_v15 = vpack.c.bf16 %v421_v13, %v417_v12  ;;  %v423_v19 = vld [vmem:[%s1704_s5 + $0x38] sm:$0xff]  ;;  %v1076_v20 = vpack.c.bf16 %v420_v16, %v416_v14  ;;  %v418_v25 = vld [vmem:[%s1704_s5 + $0x10] sm:$0xff]  ;;  %v590_v30 = vld [vmem:[%s1705_s6 + $0x80] sm:$0xff] }
  0x20   :  { %1047 = vmatprep.subr.bf16.mxu1 %v1046_v29  ;;  %v1078_v22 = vpack.c.bf16 %v423_v19, %v419_v18  ;;  %v422_v26 = vld [vmem:[%s1704_s5 + $0x30] sm:$0xff]  ;;  %v591_v31 = vld [vmem:[%s1705_s6 + $0x88] sm:$0xff]  ;;  %v609_v53 = vld [vmem:[%s1705_s6 + $0x118] sm:$0xff] }
  0x21   :  { %1017 = vmatpush3.bf16.msra.mxu0 %v1016_v32  ;;  %v1080_v28 = vpack.c.bf16 %v422_v26, %v418_v25  ;;  %v622_v32 = vld [vmem:[%s1705_s6 + $0x180] sm:$0xff]  ;;  %v595_v56 = vld [vmem:[%s1705_s6 + $0xa8] sm:$0xff]  ;;  %v596_v4 = vld [vmem:[%s1705_s6 + $0xb0] sm:$0xff] }
  0x22   :  { %1050 = vmatprep.subr.bf16.mxu0 %v1153_v49  ;;  %v594_v54 = vld [vmem:[%s1705_s6 + $0xa0] sm:$0xff]  ;;  %v611_v3 = vld [vmem:[%s1705_s6 + $0x128] sm:$0xff]  ;;  %v628_v6 = vld [vmem:[%s1705_s6 + $0x1b0] sm:$0xff] }
  0x23   :  { %1049 = vmatpush3.bf16.msra.mxu1 %v1048_v33  ;;  %v1082_v33 = vpack.c.bf16 %v591_v31, %v590_v30  ;;  %v626_v57 = vld [vmem:[%s1705_s6 + $0x1a0] sm:$0xff]  ;;  %v629_v7 = vld [vmem:[%s1705_s6 + $0x1b8] sm:$0xff]  ;;  %v580_v10 = vld [vmem:[%s1705_s6 + $0x30] sm:$0xff] }
  0x24   :  { %170 = vmatmul.mubr.f32.vlgmr.msra.gmra.mrb[0].mxu0 %v1408_v34  ;;  %1062 = vmatprep.subr.bf16.mxu1 %v1153_v49  ;;  %v1126_v13 = vpack.c.bf16 %v629_v7, %v628_v6  ;;  %v612_v14 = vld [vmem:[%s1705_s6 + $0x130] sm:$0xff]  ;;  %v598_v16 = vld [vmem:[%s1705_s6 + $0xc0] sm:$0xff]  ;;  %v599_v18 = vld [vmem:[%s1705_s6 + $0xc8] sm:$0xff] }
  0x25   :  { %1052 = vmatpush3.bf16.msra.mxu0 %v1051_v48  ;;  %964 = vmatprep.mubr.msk.f32.mxu0 %vm1154_vm1, %v1155_v58  ;;  %v576_v48 = vld [vmem:[%s1705_s6 + $0x10] sm:$0xff]  ;;  %v630_v19 = vld [vmem:[%s1705_s6 + $0x1c0] sm:$0xff]  ;;  %v583_v25 = vld [vmem:[%s1705_s6 + $0x48] sm:$0xff]  ;;  %v1098_v26 = vpack.c.bf16 %v599_v18, %v598_v16  ;;  %v639_v16 = vstv %s1706_s7 }
  0x26   :  { %240 = vmatmul.mubr.f32.vlgmr.msra.gmra.mrb[0].mxu1 %v1413_v35  ;;  %1053 = vmatprep.subr.bf16.mxu0 %v1153_v49  ;;  %v600_v30 = vld [vmem:[%s1705_s6 + $0xd0] sm:$0xff]  ;;  %v601_v31 = vld [vmem:[%s1705_s6 + $0xd8] sm:$0xff] }
  0x27   :  { %983 = vmatprep.mubr.msk.f32.mxu1 %vm1154_vm1, %v1155_v58  ;;  %1064 = vmatpush3.bf16.msra.mxu1 %v1063_v62  ;;  %v578_v62 = vld [vmem:[%s1705_s6 + $0x20] sm:$0xff] }
  0x28   :  { %1065 = vmatprep.subr.bf16.mxu1 %v1153_v49 }
  0x29   :  { %1055 = vmatpush3.bf16.msra.mxu0 %v1054_v52  ;;  %v608_v52 = vld [vmem:[%s1705_s6 + $0x110] sm:$0xff] }
  0x2a   :  { %1056 = vmatprep.subr.bf16.mxu0 %v1153_v49  ;;  %v1120_v61 = vpack.c.bf16 %v609_v53, %v608_v52  ;;  %v587_v53 = vld [vmem:[%s1705_s6 + $0x68] sm:$0xff] }
  0x2b   :  { %1067 = vmatpush3.bf16.msra.mxu1 %v1066_v5  ;;  %v597_v5 = vld [vmem:[%s1705_s6 + $0xb8] sm:$0xff] }
  0x2c   :  { %1068 = vmatprep.subr.bf16.mxu1 %v1153_v49  ;;  %v1094_v12 = vpack.c.bf16 %v597_v5, %v596_v4  ;;  %v621_v4 = vld [vmem:[%s1705_s6 + $0x178] sm:$0xff] }
  0x2d   :  { %1058 = vmatpush3.bf16.msra.mxu0 %v1057_v55 }
  0x2e   :  { %1059 = vmatprep.subr.bf16.mxu0 %v1153_v49 }
  0x2f   :  { %1070 = vmatpush3.bf16.msra.mxu1 %v1069_v8 }
  0x30   :  { %1071 = vmatprep.subr.bf16.mxu1 %v1153_v49  ;;  %v577_v49 = vld [vmem:[%s1705_s6 + $0x18] sm:$0xff] }
  0x31   :  { %1061 = vmatpush3.bf16.msra.mxu0 %v1060_v59  ;;  %v1088_v60 = vpack.c.bf16 %v577_v49, %v576_v48 }
  0x32   :  { %1075 = vmatprep.subr.bf16.mxu0 %v1074_v15  ;;  %v613_v15 = vld [vmem:[%s1705_s6 + $0x138] sm:$0xff] }
  0x33   :  { %1073 = vmatpush3.bf16.msra.mxu1 %v1072_v11  ;;  %v581_v11 = vld [vmem:[%s1705_s6 + $0x38] sm:$0xff] }
  0x34   :  { %1079 = vmatprep.subr.bf16.mxu1 %v1078_v22  ;;  %v1096_v22 = vpack.c.bf16 %v581_v11, %v580_v10 }
  0xf7   :  { %v822_v36 = vpop.f32.mrb[0].mxu0 }
  0xf8   :  { %v823_v38 = vpop.f32.mrb[1].mxu0 }
  0xf9   :  { %v857_v39 = vpop.f32.mrb[0].mxu1  ;;  %v824_v40 = vadd.f32 %v823_v38, %v822_v36  ;;  %v623_v36 = vld [vmem:[%s1705_s6 + $0x188] sm:$0xff]  ;;  %v574_v38 = vld [vmem:[%s1705_s6] sm:$0xff] }
  0xfa   :  { %v858_v41 = vpop.f32.mrb[1].mxu1 }
  0xfb   :  { %v859_v42 = vadd.f32 %v858_v41, %v857_v39  ;;  %v172_v43 = vadd.f32 %v824_v40, %v785_v37  ;;  %v1114_v37 = vpack.c.bf16 %v623_v36, %v622_v32  ;;  %v575_v39 = vld [vmem:[%s1705_s6 + $0x8] sm:$0xff]  ;;  %v606_v40 = vld [vmem:[%s1705_s6 + $0x100] sm:$0xff]  ;;  %v632_v32 = vld [vmem:[%s1705_s6 + $0x1d0] sm:$0xff] }
  0xfc   :  { %v607_v41 = vld [vmem:[%s1705_s6 + $0x108] sm:$0xff]  ;;  %v1084_v46 = vpack.c.bf16 %v575_v39, %v574_v38  ;;  %v584_v38 = vld [vmem:[%s1705_s6 + $0x50] sm:$0xff]  ;;  %v585_v39 = vld [vmem:[%s1705_s6 + $0x58] sm:$0xff] }
  0xfd   :  { %v242_v44 = vadd.f32 %v859_v42, %v172_v43  ;;  %v592_v42 = vld [vmem:[%s1705_s6 + $0x90] sm:$0xff]  ;;  %v593_v43 = vld [vmem:[%s1705_s6 + $0x98] sm:$0xff]  ;;  %v1116_v47 = vpack.c.bf16 %v607_v41, %v606_v40  ;;  %v1102_v40 = vpack.c.bf16 %v601_v31, %v600_v30  ;;  %v1104_v48 = vpack.c.bf16 %v585_v39, %v584_v38 }
  0xfe   :  { %v1086_v50 = vpack.c.bf16 %v593_v43, %v592_v42  ;;  %v616_v42 = vld [vmem:[%s1705_s6 + $0x150] sm:$0xff]  ;;  %v617_v43 = vld [vmem:[%s1705_s6 + $0x158] sm:$0xff] }
  0xff   :  { %v246_v45 = vsel %vm245_vm0, %v242_v44, -inf  ;;  %v1136_v49 = vpack.c.bf16 %v617_v43, %v616_v42 }
 0x100   :  { %247 = vmax.xlane.f32.xlu0 %v246_v45  ;;  %v625_v45 = vld [vmem:[%s1705_s6 + $0x198] sm:$0xff] }
 0x18d   :  { %v248_v63 = vpop.xlane.xlu0 %247 }
 0x18e   :  { %v249_v0 = vsub.f32 %v242_v44, %v248_v63  ;;  %v624_v44 = vld [vmem:[%s1705_s6 + $0x190] sm:$0xff]  ;;  %v579_v63 = vld [vmem:[%s1705_s6 + $0x28] sm:$0xff] }
 0x18f   :  { %v1118_v51 = vpack.c.bf16 %v625_v45, %v624_v44  ;;  %v1092_v8 = vpack.c.bf16 %v579_v63, %v578_v62  ;;  %v602_v44 = vld [vmem:[%s1705_s6 + $0xe0] sm:$0xff]  ;;  %v603_v45 = vld [vmem:[%s1705_s6 + $0xe8] sm:$0xff]  ;;  %v637_v62 = vld [vmem:[%s1705_s6 + $0x1f8] sm:$0xff] }
 0x190   :  { %v250_v1 = vmul.f32 1.442695, %v249_v0  ;;  %v1090_v0 = vpack.c.bf16 %v595_v56, %v594_v54  ;;  %v618_v54 = vld [vmem:[%s1705_s6 + $0x160] sm:$0xff]  ;;  %v588_v63 = vld [vmem:[%s1705_s6 + $0x70] sm:$0xff] }
 0x192   :  { %1149 = vpow2.f32 %v250_v1 }
 0x19c   :  { %v1150_v2 = vpop.eup %1149 }
 0x19d   :  { %965 = vmatmul.mubr.msk.f32.vlgmr.msra.gmra.mrb[2].mxu0 %vm245_vm0, %v1150_v2 }
 0x19e   :  { %492 = vmatprep.mubr.f32.mxu0 %v1155_v58  ;;  %1077 = vmatpush1.bf16.msra.mxu0 %v1076_v20  ;;  %v631_v20 = vld [vmem:[%s1705_s6 + $0x1c8] sm:$0xff] }
 0x19f   :  { %1083 = vmatprep.subr.bf16.mxu0 %v1082_v33  ;;  %v633_v33 = vld [vmem:[%s1705_s6 + $0x1d8] sm:$0xff] }
 0x1a0   :  { %v1134_v41 = vpack.c.bf16 %v633_v33, %v632_v32 }
 0x270   :  { %v329_v23 = vpop.f32.mrb[2].mxu0 }
 0x271   :  { %1151 = vrcp.f32 %v329_v23  ;;  %v966_v24 = vpop.f32.mrb[3].mxu0  ;;  %v1128_v23 = vpack.c.bf16 %v613_v15, %v612_v14 }
 0x272   :  { %v582_v24 = vld [vmem:[%s1705_s6 + $0x40] sm:$0xff] }
 0x273   :  { %v1100_v36 = vpack.c.bf16 %v583_v25, %v582_v24 }
 0x27b   :  { %v1152_v27 = vpop.eup %1151 }
 0x27c   :  { %v334_v29 = vmul.f32 %v1152_v27, %v1150_v2  ;;  %v610_v2 = vld [vmem:[%s1705_s6 + $0x120] sm:$0xff]  ;;  %v1130_v27 = vpack.c.bf16 %v631_v20, %v630_v19 }
 0x27d   :  { %v1124_v9 = vpack.c.bf16 %v611_v3, %v610_v2  ;;  %v620_v3 = vld [vmem:[%s1705_s6 + $0x170] sm:$0xff] }
 0x27e   :  { %984 = vmatmul.mubr.msk.f32.vlgmr.msra.gmra.mrb[2].mxu1 %vm245_vm0, %v334_v29  ;;  %v615_v29 = vld [vmem:[%s1705_s6 + $0x148] sm:$0xff]  ;;  %v1144_v5 = vpack.c.bf16 %v621_v4, %v620_v3 }
 0x27f   :  { %1081 = vmatpush1.bf16.msra.mxu1 %v1080_v28  ;;  %563 = vmatprep.mubr.f32.mxu1 %v1155_v58  ;;  %v627_v58 = vld [vmem:[%s1705_s6 + $0x1a8] sm:$0xff]  ;;  %v614_v28 = vld [vmem:[%s1705_s6 + $0x140] sm:$0xff] }
 0x280   :  { %1115 = vmatprep.subr.bf16.mxu1 %v1114_v37  ;;  %v1122_v1 = vpack.c.bf16 %v627_v58, %v626_v57  ;;  %v1132_v37 = vpack.c.bf16 %v615_v29, %v614_v28  ;;  %v604_v58 = vld [vmem:[%s1705_s6 + $0xf0] sm:$0xff] }
 0x351   :  { %v412_v55 = vpop.f32.mrb[2].mxu1 }
 0x352   :  { %v985_v59 = vpop.f32.mrb[3].mxu1  ;;  %788 = vmatmul.mubr.msk.f32.vlgmr.msra.gmra.mrb[4].mxu0 %vm424_vm2, %v412_v55  ;;  %789 = vmatmul.mubr.msk.f32.vlgmr.msra.gmra.mrb[4].mxu1 %vm424_vm2, %v412_v55  ;;  %v619_v55 = vld [vmem:[%s1705_s6 + $0x168] sm:$0xff] }
 0x353   :  { %1085 = vmatpush3.bf16.msra.mxu0 %v1084_v46  ;;  %1117 = vmatpush3.bf16.msra.mxu1 %v1116_v47  ;;  %v634_v46 = vld [vmem:[%s1705_s6 + $0x1e0] sm:$0xff]  ;;  %v635_v47 = vld [vmem:[%s1705_s6 + $0x1e8] sm:$0xff]  ;;  %v1140_v57 = vpack.c.bf16 %v619_v55, %v618_v54  ;;  %v605_v59 = vld [vmem:[%s1705_s6 + $0xf8] sm:$0xff] }
 0x354   :  { %1087 = vmatprep.subr.bf16.mxu0 %v1086_v50  ;;  %1119 = vmatprep.subr.bf16.mxu1 %v1118_v51  ;;  %v586_v50 = vld [vmem:[%s1705_s6 + $0x60] sm:$0xff]  ;;  %v1106_v51 = vpack.c.bf16 %v603_v45, %v602_v44  ;;  %v1138_v52 = vpack.c.bf16 %v635_v47, %v634_v46 }
 0x355   :  { %v1108_v56 = vpack.c.bf16 %v587_v53, %v586_v50 }
 0x357   :  { %1089 = vmatpush3.bf16.msra.mxu0 %v1088_v60  ;;  %1121 = vmatpush3.bf16.msra.mxu1 %v1120_v61  ;;  %v636_v60 = vld [vmem:[%s1705_s6 + $0x1f0] sm:$0xff]  ;;  %v1110_v61 = vpack.c.bf16 %v605_v59, %v604_v58 }
 0x358   :  { %1091 = vmatprep.subr.bf16.mxu0 %v1090_v0  ;;  %1123 = vmatprep.subr.bf16.mxu1 %v1122_v1  ;;  %v589_v0 = vld [vmem:[%s1705_s6 + $0x78] sm:$0xff]  ;;  %v1142_v1 = vpack.c.bf16 %v637_v62, %v636_v60 }
 0x359   :  { %v1112_v2 = vpack.c.bf16 %v589_v0, %v588_v63 }
 0x35b   :  { %1093 = vmatpush3.bf16.msra.mxu0 %v1092_v8  ;;  %1125 = vmatpush3.bf16.msra.mxu1 %v1124_v9 }
 0x35c   :  { %1095 = vmatprep.subr.bf16.mxu0 %v1094_v12  ;;  %1127 = vmatprep.subr.bf16.mxu1 %v1126_v13 }
 0x35f   :  { %1097 = vmatpush3.bf16.msra.mxu0 %v1096_v22  ;;  %1129 = vmatpush3.bf16.msra.mxu1 %v1128_v23 }
 0x360   :  { %1099 = vmatprep.subr.bf16.mxu0 %v1098_v26  ;;  %1131 = vmatprep.subr.bf16.mxu1 %v1130_v27 }
 0x363   :  { %1101 = vmatpush3.bf16.msra.mxu0 %v1100_v36  ;;  %1133 = vmatpush3.bf16.msra.mxu1 %v1132_v37 }
 0x364   :  { %1103 = vmatprep.subr.bf16.mxu0 %v1102_v40  ;;  %1135 = vmatprep.subr.bf16.mxu1 %v1134_v41 }
 0x367   :  { %1105 = vmatpush3.bf16.msra.mxu0 %v1104_v48  ;;  %1137 = vmatpush3.bf16.msra.mxu1 %v1136_v49 }
 0x368   :  { %1107 = vmatprep.subr.bf16.mxu0 %v1106_v51  ;;  %1139 = vmatprep.subr.bf16.mxu1 %v1138_v52 }
 0x36b   :  { %1109 = vmatpush3.bf16.msra.mxu0 %v1108_v56  ;;  %1141 = vmatpush3.bf16.msra.mxu1 %v1140_v57 }
 0x36c   :  { %1111 = vmatprep.subr.bf16.mxu0 %v1110_v61  ;;  %1143 = vmatprep.subr.bf16.mxu1 %v1142_v1 }
 0x36f   :  { %1113 = vmatpush3.bf16.msra.mxu0 %v1112_v2  ;;  %1145 = vmatpush3.bf16.msra.mxu1 %v1144_v5 }
 0x425   :  { %v494_v6 = vpop.f32.mrb[4].mxu0  ;;  %v565_v7 = vpop.f32.mrb[4].mxu1 }
 0x426   :  { %v496_v8 = vpop.f32.mrb[5].mxu0  ;;  %v567_v9 = vpop.f32.mrb[5].mxu1  ;;  %v570_v12 = vmul.f32 %v494_v6, %v1408_v34  ;;  %v572_v13 = vmul.f32 %v565_v7, %v1413_v35 }
 0x427   :  { %v571_v10 = vmul.f32 %v496_v8, %v1372_v17  ;;  %v573_v11 = vmul.f32 %v567_v9, %v1384_v21 }
 0x429   :  { %704 = vmatprep.mubr.f32.mxu0 %v571_v10  ;;  %774 = vmatprep.mubr.f32.mxu1 %v573_v11 }
 0x42a   :  { %705 = vmatmul.mubr.f32.vlgmr.msra.gmra.mrb[6].mxu0 %v570_v12  ;;  %775 = vmatmul.mubr.f32.vlgmr.msra.gmra.mrb[6].mxu1 %v572_v13 }
 0x4fd   :  { %v910_v14 = vpop.f32.mrb[6].mxu0  ;;  %v945_v15 = vpop.f32.mrb[6].mxu1 }
 0x4fe   :  { %v911_v18 = vpop.f32.mrb[7].mxu0  ;;  %v946_v19 = vpop.f32.mrb[7].mxu1 }
 0x4ff   :  { %v912_v20 = vadd.f32 %v911_v18, %v910_v14  ;;  %v947_v17 = vadd.f32 %v946_v19, %v945_v15 }
 0x501   :  { %v707_v22 = vadd.f32 %v912_v20, %v639_v16 }
 0x503   :  { %v777_v21 = vadd.f32 %v947_v17, %v707_v22 }
 0x505   :  { %780 = vst [vmem:[%s1707_s8] sm:$0xff] %v777_v21 }

</bundles_post_ra>
